<compile_context>
chip_gen: v7x
topology: tpu7x:2x2x1
jax: 0.10.0
libtpu: 0.0.40
codegen_flags: <defaults>
</compile_context>

<pallas_src>
import jax
import jax.numpy as jnp
from jax.experimental import pallas as pl
from jax.experimental.pallas import tpu as pltpu

LATENT = 16    # VAE.latent_dim
HIDDEN = 100   # fixed by _enc_mu / _enc_log_sigma: Linear(100, 16)
LANE = 128     # TPU lane width
SUBLANE = 8


def _round_up(x, m):
    return (x + m - 1) // m * m


def vae_kernel(state_ref,     # (TB, D_IN)        streaming dtype
               eps_ref,       # (TB, LATENT)      streaming dtype
               enc_w_ref,     # (D_IN, H_PAD)     f32, VMEM-resident
               head_w_ref,    # (H_PAD, 2*LATENT) f32  = [mu_w | log_sigma_w]
               dec_w_ref,     # (LATENT, D_OUT)   f32
               bias_ref,      # (3, LANE)         f32  rows: enc_b, head_b, dec_b
               out_ref):      # (TB, W_PAD)       packed [out | mu | sigma | z | 0]
    tb = state_ref.shape[0]
    h_pad = enc_w_ref.shape[1]
    d_out = dec_w_ref.shape[1]

    enc_b = bias_ref[0:1, :h_pad]
    head_b = bias_ref[1:2, :2 * LATENT]
    dec_b = bias_ref[2:3, :d_out]

    # Encoder: h = relu(state @ W_enc + b_enc)   (padded hidden lanes stay exactly 0)
    x = state_ref[...].astype(jnp.float32)
    h = jnp.dot(x, enc_w_ref[...], preferred_element_type=jnp.float32) + enc_b
    h = jnp.maximum(h, 0.0)

    # Fused latent heads: one matmul produces [mu | log_sigma].
    heads = jnp.dot(h, head_w_ref[...], preferred_element_type=jnp.float32) + head_b
    mu = heads[:, :LATENT]
    sigma = jnp.exp(heads[:, LATENT:])

    # Reparameterization (eps supplied as an input — deterministic, no EUP sampling).
    z = mu + sigma * eps_ref[...].astype(jnp.float32)

    # Decoder: out = z @ W_dec + b_dec
    dec = jnp.dot(z, dec_w_ref[...], preferred_element_type=jnp.float32) + dec_b

    # Single packed, lane-dense output block; static sub-slice stores (no concat).
    out_ref[:, :d_out] = dec.astype(out_ref.dtype)
    out_ref[:, d_out:d_out + LATENT] = mu.astype(out_ref.dtype)
    out_ref[:, d_out + LATENT:d_out + 2 * LATENT] = sigma.astype(out_ref.dtype)
    out_ref[:, d_out + 2 * LATENT:d_out + 3 * LATENT] = z.astype(out_ref.dtype)
    pad = out_ref.shape[1] - (d_out + 3 * LATENT)
    if pad > 0:
        out_ref[:, d_out + 3 * LATENT:] = jnp.zeros((tb, pad), out_ref.dtype)


def pack_params(p):
    """Fuse the two latent heads and zero-pad the hidden dim to a lane multiple."""
    d_out = p["dec_w"].shape[1]
    h_pad = _round_up(HIDDEN, LANE)

    enc_w = jnp.pad(p["enc_w"].astype(jnp.float32), ((0, 0), (0, h_pad - HIDDEN)))
    head_w = jnp.concatenate([p["mu_w"], p["ls_w"]], axis=1).astype(jnp.float32)  # (100,32)
    head_w = jnp.pad(head_w, ((0, h_pad - HIDDEN), (0, 0)))                       # (128,32)
    dec_w = p["dec_w"].astype(jnp.float32)                                        # (16,d_out)

    bias_w = max(h_pad, d_out, 2 * LATENT, LANE)
    bias = jnp.zeros((3, bias_w), jnp.float32)
    bias = bias.at[0, :HIDDEN].set(p["enc_b"].reshape(-1).astype(jnp.float32))
    bias = bias.at[1, :2 * LATENT].set(
        jnp.concatenate([p["mu_b"].reshape(-1), p["ls_b"].reshape(-1)]).astype(jnp.float32))
    bias = bias.at[2, :d_out].set(p["dec_b"].reshape(-1).astype(jnp.float32))
    return enc_w, head_w, dec_w, bias, d_out


def vae_forward(state, eps, params, tb=1024):
    """Fused VAE forward.

    state: (B, D_IN), eps: (B, LATENT) ~ N(0,1).
    Returns the packed (B, W_PAD) buffer whose lanes are
      [0:d_out]                         decoder output
      [d_out:d_out+LATENT]              mu      (z_mean)
      [d_out+LATENT:d_out+2*LATENT]     sigma   (z_sigma)
      [d_out+2*LATENT:d_out+3*LATENT]   z
    plus d_out.  Consumers should index the packed buffer directly (avoids extra
    whole-array slice passes).  Streaming dtype follows state.dtype (use bf16 state
    to halve HBM traffic; matmul/exp math is f32 in-kernel regardless).
    """
    B, d_in = state.shape
    enc_w, head_w, dec_w, bias, d_out = pack_params(params)
    h_pad = enc_w.shape[1]
    w_pad = _round_up(d_out + 3 * LATENT, LANE)
    stream_dtype = state.dtype

    # --- batch tiling: big tiles; >=2 grid steps when B allows (v7x megacore). ---
    tb = max(SUBLANE, min(tb, B))
    if B >= 2 * SUBLANE:
        tb = min(tb, _round_up(-(-B // 2), SUBLANE))   # cap at ceil(B/2), sublane-aligned
    tb = _round_up(tb, SUBLANE)

    # Pad batch to a multiple of tb with zero rows so every row that reaches exp()
    # is well-defined (zeros -> finite everywhere).  No-op when B % tb == 0.
    b_pad = _round_up(B, tb)
    if b_pad != B:
        state = jnp.pad(state, ((0, b_pad - B), (0, 0)))
        eps = jnp.pad(eps, ((0, b_pad - B), (0, 0)))
    eps = eps.astype(stream_dtype)
    nb = b_pad // tb

    grid_spec = pltpu.PrefetchScalarGridSpec(
        num_scalar_prefetch=0,
        grid=(nb,),
        in_specs=[
            pl.BlockSpec((tb, d_in), lambda i: (i, 0)),            # batch tiles
            pl.BlockSpec((tb, LATENT), lambda i: (i, 0)),          # eps tiles
            pl.BlockSpec((d_in, h_pad), lambda i: (0, 0)),         # weights stay
            pl.BlockSpec((h_pad, 2 * LATENT), lambda i: (0, 0)),   # resident in
            pl.BlockSpec((LATENT, d_out), lambda i: (0, 0)),       # VMEM
            pl.BlockSpec(bias.shape, lambda i: (0, 0)),
        ],
        out_specs=pl.BlockSpec((tb, w_pad), lambda i: (i, 0)),     # single packed block
    )

    itemsize = jnp.dtype(stream_dtype).itemsize
    flops = 2 * b_pad * (d_in * h_pad + h_pad * 2 * LATENT + LATENT * d_out)
    bytes_accessed = (itemsize * b_pad * (d_in + LATENT + w_pad)
                      + 4 * (enc_w.size + head_w.size + dec_w.size + bias.size))
    cost = pl.CostEstimate(flops=flops,
                           transcendentals=b_pad * LATENT,     # exp() only
                           bytes_accessed=bytes_accessed)

    # Double-buffered streaming tiles + resident weights, with headroom.
    tile_bytes = 2 * tb * (d_in + LATENT + w_pad) * itemsize
    weight_bytes = 4 * (enc_w.size + head_w.size + dec_w.size + bias.size)
    vmem_limit = int(min(64 << 20, max(32 << 20, 2 * (tile_bytes + weight_bytes))))

    packed = pl.pallas_call(
        vae_kernel,
        out_shape=jax.ShapeDtypeStruct((b_pad, w_pad), stream_dtype),
        grid_spec=grid_spec,
        compiler_params=pltpu.CompilerParams(
            dimension_semantics=("parallel",),
            vmem_limit_bytes=vmem_limit),
        cost_estimate=cost,
    )(state, eps, enc_w, head_w, dec_w, bias)

    if b_pad != B:
        packed = packed[:B]
    return packed, d_out


def init_params(key, d_in, d_out):
    ks = jax.random.split(key, 8)
    s = 0.1
    return {
        "enc_w": s * jax.random.normal(ks[0], (d_in, HIDDEN), jnp.float32),
        "enc_b": s * jax.random.normal(ks[1], (HIDDEN,), jnp.float32),
        "mu_w":  s * jax.random.normal(ks[2], (HIDDEN, LATENT), jnp.float32),
        "mu_b":  s * jax.random.normal(ks[3], (LATENT,), jnp.float32),
        "ls_w":  s * jax.random.normal(ks[4], (HIDDEN, LATENT), jnp.float32),
        "ls_b":  s * jax.random.normal(ks[5], (LATENT,), jnp.float32),
        "dec_w": s * jax.random.normal(ks[6], (LATENT, d_out), jnp.float32),
        "dec_b": s * jax.random.normal(ks[7], (d_out,), jnp.float32),
    }


def reference_forward(state, eps, p):
    h = jnp.maximum(state @ p["enc_w"] + p["enc_b"], 0.0)
    mu = h @ p["mu_w"] + p["mu_b"]
    sigma = jnp.exp(h @ p["ls_w"] + p["ls_b"])
    z = mu + sigma * eps
    out = z @ p["dec_w"] + p["dec_b"]
    return out, mu, sigma, z


if __name__ == "__main__":
    key = jax.random.PRNGKey(0)
    k_param, k_state, k_eps = jax.random.split(key, 3)

    B, D_IN, D_OUT = 8, 64, 64   # small mocap-like feature sizes
    params = init_params(k_param, D_IN, D_OUT)
    state = jax.random.normal(k_state, (B, D_IN), jnp.float32)
    eps = jax.random.normal(k_eps, (B, LATENT), jnp.float32)

    packed, d_out = vae_forward(state, eps, params)
    packed = jax.block_until_ready(packed)
    assert packed.shape[0] == B and packed.shape[1] % LANE == 0

    # Verification-only slicing of the packed layout (consumers can index directly).
    useful = packed[:, :d_out + 3 * LATENT]
    out = useful[:, :d_out]
    mu = useful[:, d_out:d_out + LATENT]
    sigma = useful[:, d_out + LATENT:d_out + 2 * LATENT]
    z = useful[:, d_out + 2 * LATENT:d_out + 3 * LATENT]
    assert out.shape == (B, D_OUT)

    # Fully deterministic end-to-end check against a pure-JAX reference.
    out_ref, mu_ref, sigma_ref, z_ref = reference_forward(state, eps, params)
    assert jnp.allclose(mu, mu_ref, atol=2e-3, rtol=2e-3), "mu mismatch"
    assert jnp.allclose(sigma, sigma_ref, atol=2e-3, rtol=2e-3), "sigma mismatch"
    assert jnp.allclose(z, z_ref, atol=2e-3, rtol=2e-3), "z mismatch"
    assert jnp.allclose(out, out_ref, atol=2e-3, rtol=2e-3), "decoder mismatch"
    assert bool(jnp.all(jnp.isfinite(packed)))

    print("KERNEL_OK")
</pallas_src>

<mosaic_0001>
module attributes {stable_mosaic.version = 11 : i64} {
  func.func @vae_kernel(%arg0: i32, %arg1: memref<8x64xf32, #tpu.memory_space<vmem>>, %arg2: memref<8x16xf32, #tpu.memory_space<vmem>>, %arg3: memref<64x128xf32, #tpu.memory_space<vmem>>, %arg4: memref<128x32xf32, #tpu.memory_space<vmem>>, %arg5: memref<16x64xf32, #tpu.memory_space<vmem>>, %arg6: memref<3x128xf32, #tpu.memory_space<vmem>>, %arg7: memref<8x128xf32, #tpu.memory_space<vmem>>) attributes {dimension_semantics = [#tpu.dimension_semantics<parallel>], iteration_bounds = array<i64: 1>, scalar_prefetch = 0 : i64, scratch_operands = 0 : i64, tpu.core_type = #tpu.core_type<tc>, window_params = [{transform_indices = @transform_0, window_bounds = array<i64: 8, 64>}, {transform_indices = @transform_1, window_bounds = array<i64: 8, 16>}, {pipeline_mode = #tpu.pipeline_mode<synchronous>, transform_indices = @transform_2, window_bounds = array<i64: 64, 128>}, {pipeline_mode = #tpu.pipeline_mode<synchronous>, transform_indices = @transform_3, window_bounds = array<i64: 128, 32>}, {pipeline_mode = #tpu.pipeline_mode<synchronous>, transform_indices = @transform_4, window_bounds = array<i64: 16, 64>}, {pipeline_mode = #tpu.pipeline_mode<synchronous>, transform_indices = @transform_5, window_bounds = array<i64: 3, 128>}, {transform_indices = @transform_6, window_bounds = array<i64: 8, 128>}]} {
    %c0 = arith.constant 0 : index
    %c0_0 = arith.constant 0 : index
    %0 = vector.load %arg6[%c0, %c0_0] : memref<3x128xf32, #tpu.memory_space<vmem>>, vector<1x128xf32>
    %c1 = arith.constant 1 : index
    %c0_1 = arith.constant 0 : index
    %1 = vector.load %arg6[%c1, %c0_1] : memref<3x128xf32, #tpu.memory_space<vmem>>, vector<1x32xf32>
    %c2 = arith.constant 2 : index
    %c0_2 = arith.constant 0 : index
    %2 = vector.load %arg6[%c2, %c0_2] : memref<3x128xf32, #tpu.memory_space<vmem>>, vector<1x64xf32>
    %c0_3 = arith.constant 0 : index
    %c0_4 = arith.constant 0 : index
    %3 = vector.load %arg1[%c0_3, %c0_4] : memref<8x64xf32, #tpu.memory_space<vmem>>, vector<8x64xf32>
    %c0_5 = arith.constant 0 : index
    %c0_6 = arith.constant 0 : index
    %4 = vector.load %arg3[%c0_5, %c0_6] : memref<64x128xf32, #tpu.memory_space<vmem>>, vector<64x128xf32>
    %cst = arith.constant dense<0.000000e+00> : vector<8x128xf32>
    %5 = tpu.matmul %3, %4, %cst {dimension_numbers = #tpu.dot_dimension_numbers<[1], [0], [0], [1], [0, 0, 1, 1], [], []>} : vector<8x64xf32>, vector<64x128xf32>, vector<8x128xf32> -> vector<8x128xf32>
    %6 = vector.broadcast %0 : vector<1x128xf32> to vector<8x128xf32>
    %7 = arith.addf %5, %6 : vector<8x128xf32>
    %cst_7 = arith.constant 0.000000e+00 : f32
    %8 = vector.broadcast %cst_7 : f32 to vector<8x128xf32>
    %9 = arith.maximumf %7, %8 : vector<8x128xf32>
    %c0_8 = arith.constant 0 : index
    %c0_9 = arith.constant 0 : index
    %10 = vector.load %arg4[%c0_8, %c0_9] : memref<128x32xf32, #tpu.memory_space<vmem>>, vector<128x32xf32>
    %cst_10 = arith.constant dense<0.000000e+00> : vector<8x32xf32>
    %11 = tpu.matmul %9, %10, %cst_10 {dimension_numbers = #tpu.dot_dimension_numbers<[1], [0], [0], [1], [0, 0, 1, 1], [], []>} : vector<8x128xf32>, vector<128x32xf32>, vector<8x32xf32> -> vector<8x32xf32>
    %12 = vector.broadcast %1 : vector<1x32xf32> to vector<8x32xf32>
    %13 = arith.addf %11, %12 : vector<8x32xf32>
    %14 = vector.extract_strided_slice %13 {offsets = [0, 0], sizes = [8, 16], strides = [1, 1]} : vector<8x32xf32> to vector<8x16xf32>
    %15 = vector.extract_strided_slice %13 {offsets = [0, 16], sizes = [8, 16], strides = [1, 1]} : vector<8x32xf32> to vector<8x16xf32>
    %16 = math.exp %15 : vector<8x16xf32>
    %c0_11 = arith.constant 0 : index
    %c0_12 = arith.constant 0 : index
    %17 = vector.load %arg2[%c0_11, %c0_12] : memref<8x16xf32, #tpu.memory_space<vmem>>, vector<8x16xf32>
    %18 = arith.mulf %16, %17 : vector<8x16xf32>
    %19 = arith.addf %14, %18 : vector<8x16xf32>
    %c0_13 = arith.constant 0 : index
    %c0_14 = arith.constant 0 : index
    %20 = vector.load %arg5[%c0_13, %c0_14] : memref<16x64xf32, #tpu.memory_space<vmem>>, vector<16x64xf32>
    %cst_15 = arith.constant dense<0.000000e+00> : vector<8x64xf32>
    %21 = tpu.matmul %19, %20, %cst_15 {dimension_numbers = #tpu.dot_dimension_numbers<[1], [0], [0], [1], [0, 0, 1, 1], [], []>} : vector<8x16xf32>, vector<16x64xf32>, vector<8x64xf32> -> vector<8x64xf32>
    %22 = vector.broadcast %2 : vector<1x64xf32> to vector<8x64xf32>
    %23 = arith.addf %21, %22 : vector<8x64xf32>
    %c0_16 = arith.constant 0 : index
    %c0_17 = arith.constant 0 : index
    %24 = vector.load %arg7[%c0_16, %c0_17] : memref<8x128xf32, #tpu.memory_space<vmem>>, vector<8x64xf32>
    tpu.vector_store %arg7[%c0_16, %c0_17], %23 {strides = array<i32>} : memref<8x128xf32, #tpu.memory_space<vmem>>, vector<8x64xf32>,
    %c0_18 = arith.constant 0 : index
    %c64 = arith.constant 64 : index
    %25 = vector.load %arg7[%c0_18, %c64] : memref<8x128xf32, #tpu.memory_space<vmem>>, vector<8x16xf32>
    tpu.vector_store %arg7[%c0_18, %c64], %14 {strides = array<i32>} : memref<8x128xf32, #tpu.memory_space<vmem>>, vector<8x16xf32>,
    %c0_19 = arith.constant 0 : index
    %c80 = arith.constant 80 : index
    %26 = vector.load %arg7[%c0_19, %c80] : memref<8x128xf32, #tpu.memory_space<vmem>>, vector<8x16xf32>
    tpu.vector_store %arg7[%c0_19, %c80], %16 {strides = array<i32>} : memref<8x128xf32, #tpu.memory_space<vmem>>, vector<8x16xf32>,
    %c0_20 = arith.constant 0 : index
    %c96 = arith.constant 96 : index
    %27 = vector.load %arg7[%c0_20, %c96] : memref<8x128xf32, #tpu.memory_space<vmem>>, vector<8x16xf32>
    tpu.vector_store %arg7[%c0_20, %c96], %19 {strides = array<i32>} : memref<8x128xf32, #tpu.memory_space<vmem>>, vector<8x16xf32>,
    %cst_21 = arith.constant 0.000000e+00 : f32
    %28 = vector.broadcast %cst_21 : f32 to vector<8x16xf32>
    %c0_22 = arith.constant 0 : index
    %c112 = arith.constant 112 : index
    %29 = vector.load %arg7[%c0_22, %c112] : memref<8x128xf32, #tpu.memory_space<vmem>>, vector<8x16xf32>
    tpu.vector_store %arg7[%c0_22, %c112], %28 {strides = array<i32>} : memref<8x128xf32, #tpu.memory_space<vmem>>, vector<8x16xf32>,
    return
  }
  func.func @transform_0(%arg0: i32) -> (i32, i32) {
    %c0_i32 = arith.constant 0 : i32
    %c0_i32_0 = arith.constant 0 : i32
    return %arg0, %c0_i32 : i32, i32
  }
  func.func @transform_1(%arg0: i32) -> (i32, i32) {
    %c0_i32 = arith.constant 0 : i32
    %c0_i32_0 = arith.constant 0 : i32
    return %arg0, %c0_i32 : i32, i32
  }
  func.func @transform_2(%arg0: i32) -> (i32, i32) {
    %c0_i32 = arith.constant 0 : i32
    %c0_i32_0 = arith.constant 0 : i32
    %c0_i32_1 = arith.constant 0 : i32
    return %c0_i32, %c0_i32_0 : i32, i32
  }
  func.func @transform_3(%arg0: i32) -> (i32, i32) {
    %c0_i32 = arith.constant 0 : i32
    %c0_i32_0 = arith.constant 0 : i32
    %c0_i32_1 = arith.constant 0 : i32
    return %c0_i32, %c0_i32_0 : i32, i32
  }
  func.func @transform_4(%arg0: i32) -> (i32, i32) {
    %c0_i32 = arith.constant 0 : i32
    %c0_i32_0 = arith.constant 0 : i32
    %c0_i32_1 = arith.constant 0 : i32
    return %c0_i32, %c0_i32_0 : i32, i32
  }
  func.func @transform_5(%arg0: i32) -> (i32, i32) {
    %c0_i32 = arith.constant 0 : i32
    %c0_i32_0 = arith.constant 0 : i32
    %c0_i32_1 = arith.constant 0 : i32
    return %c0_i32, %c0_i32_0 : i32, i32
  }
  func.func @transform_6(%arg0: i32) -> (i32, i32) {
    %c0_i32 = arith.constant 0 : i32
    %c0_i32_0 = arith.constant 0 : i32
    return %arg0, %c0_i32 : i32, i32
  }
}

</mosaic_0001>

<bundles_post_ra>
// kernel: tpu_custom_call.1
= control target key start
LH: loop header
LB: loop body
LE: loop exit
PB: predicated region body
PF: predicated region fallthrough
CT: control target
= control target key end

     0   :  { %v500_v3 = vmov 0.0|0.0   ;;  %vm501_vm0 = vmmov 0   ;;  %v502_v6 = vmov 0.0   ;;  %s657_s0 = inlined_call_operand.vmem [shape: f32[8,64], index: 0, kind: input, shape index: {}]   ;;  %s658_s1 = inlined_call_operand.vmem [shape: f32[8,16], index: 1, kind: input, shape index: {}]   ;;  %s659_s2 = inlined_call_operand.vmem [shape: f32[64,128], index: 2, kind: input, shape index: {}]   ;;  %s660_s3 = inlined_call_operand.vmem [shape: f32[128,32], index: 3, kind: input, shape index: {}]   ;;  %s661_s4 = inlined_call_operand.vmem [shape: f32[16,64], index: 4, kind: input, shape index: {}]   ;;  %s662_s5 = inlined_call_operand.vmem [shape: f32[3,128], index: 5, kind: input, shape index: {}]   ;;  %s663_s6 = inlined_call_operand.hbm [shape: f32[8,128], index: 6, kind: output, shape index: {}]  }
   0x1   :  { %v28_v0 = vld [vmem:[%s659_s2] sm:$0xff]  ;;  %v29_v1 = vld [vmem:[%s659_s2 + $0x8] sm:$0xff]  ;;  %v30_v2 = vld [vmem:[%s659_s2 + $0x10] sm:$0xff]  ;;  %427 = vmatprep.subr.bf16.mxu0 %v500_v3  ;;  %382 = vmatprep.mubr.msk.f32.mxu0 %vm501_vm0, %v502_v6 }
   0x2   :  { %v428_v4 = vpack.c.bf16 %v29_v1, %v28_v0  ;;  %v31_v5 = vld [vmem:[%s659_s2 + $0x18] sm:$0xff]  ;;  %439 = vmatprep.subr.bf16.mxu1 %v500_v3  ;;  %417 = vmatprep.mubr.msk.f32.mxu1 %vm501_vm0, %v502_v6  ;;  %v115_v8 = vld [vmem:[%s660_s3] sm:$0xff]  ;;  %v116_v9 = vld [vmem:[%s660_s3 + $0x8] sm:$0xff] }
   0x3   :  { %v431_v7 = vpack.c.bf16 %v31_v5, %v30_v2  ;;  %v117_v10 = vld [vmem:[%s660_s3 + $0x10] sm:$0xff]  ;;  %v32_v11 = vld [vmem:[%s659_s2 + $0x20] sm:$0xff]  ;;  %v33_v12 = vld [vmem:[%s659_s2 + $0x28] sm:$0xff]  ;;  %v440_v13 = vpack.c.bf16 %v116_v9, %v115_v8 }
   0x4   :  { %429 = vmatpush3.bf16.msra.mxu0 %v428_v4  ;;  %v118_v14 = vld [vmem:[%s660_s3 + $0x18] sm:$0xff]  ;;  %v434_v16 = vpack.c.bf16 %v33_v12, %v32_v11  ;;  %v119_v17 = vld [vmem:[%s660_s3 + $0x20] sm:$0xff]  ;;  %v120_v18 = vld [vmem:[%s660_s3 + $0x28] sm:$0xff] }
   0x5   :  { %430 = vmatprep.subr.bf16.mxu0 %v500_v3  ;;  %441 = vmatpush3.bf16.msra.mxu1 %v440_v13  ;;  %v443_v15 = vpack.c.bf16 %v118_v14, %v117_v10  ;;  %v34_v19 = vld [vmem:[%s659_s2 + $0x30] sm:$0xff]  ;;  %v35_v20 = vld [vmem:[%s659_s2 + $0x38] sm:$0xff] }
   0x6   :  { %442 = vmatprep.subr.bf16.mxu1 %v500_v3 }
   0x8   :  { %432 = vmatpush3.bf16.msra.mxu0 %v431_v7 }
   0x9   :  { %433 = vmatprep.subr.bf16.mxu0 %v500_v3 }
   0xa   :  { %11 = vsyncpa [#allocation3], 0  ;;  %444 = vmatpush3.bf16.msra.mxu1 %v443_v15  ;;  %v446_v21 = vpack.c.bf16 %v120_v18, %v119_v17  ;;  %v437_v22 = vpack.c.bf16 %v35_v20, %v34_v19  ;;  %v121_v23 = vld [vmem:[%s660_s3 + $0x30] sm:$0xff]  ;;  %v122_v24 = vld [vmem:[%s660_s3 + $0x38] sm:$0xff]  ;;  %vm40_vm1 = vcmask 523264   ;;  %s503_s23 = smov 16  }
   0xb   :  { %445 = vmatprep.subr.bf16.mxu1 %v500_v3  ;;  %v449_v25 = vpack.c.bf16 %v122_v24, %v121_v23  ;;  %v27_v26 = vld [vmem:[%s657_s0] sm:$0xff]  ;;  %v124_v28 = vld [vmem:[%s660_s3 + $0x48] sm:$0xff]  ;;  %v125_v30 = vld [vmem:[%s660_s3 + $0x50] sm:$0xff]  ;;  %s504_s2 = smov 64   ;;  %s505_s30 = smov 112   ;;  %vm224_vm2 = vcmask 130048  }
   0xc   :  { %435 = vmatpush3.bf16.msra.mxu0 %v434_v16  ;;  %v123_v27 = vld [vmem:[%s660_s3 + $0x40] sm:$0xff]  ;;  %v126_v31 = vld [vmem:[%s660_s3 + $0x58] sm:$0xff]  ;;  %v128_v34 = vld [vmem:[%s660_s3 + $0x68] sm:$0xff]  ;;  %s506_s7 = smov 96   ;;  %vm303_vm3 = vcmask 654848   ;;  %vm309_vm4 = vcmask 786048  }
   0xd   :  { %436 = vmatprep.subr.bf16.mxu0 %v500_v3  ;;  %v452_v29 = vpack.c.bf16 %v124_v28, %v123_v27  ;;  %v455_v32 = vpack.c.bf16 %v126_v31, %v125_v30  ;;  %v127_v33 = vld [vmem:[%s660_s3 + $0x60] sm:$0xff]  ;;  %v129_v36 = vld [vmem:[%s660_s3 + $0x70] sm:$0xff]  ;;  %v130_v37 = vld [vmem:[%s660_s3 + $0x78] sm:$0xff]  ;;  %s507_s9 = smov [#allocation2]   ;;  %vm314_vm5 = vcmask 917248   ;;  %vm316_vm6 = vcmask 1048448  }
   0xe   :  { %447 = vmatpush3.bf16.msra.mxu1 %v446_v21  ;;  %v458_v35 = vpack.c.bf16 %v128_v34, %v127_v33  ;;  %v461_v38 = vpack.c.bf16 %v130_v37, %v129_v36  ;;  %v207_v39 = vld [vmem:[%s658_s1] sm:$0xff]  ;;  %v219_v50 = vld [vmem:[%s661_s4 + $0x8] sm:$0xff]  ;;  %s324_s10 = sshll.u32 %s507_s9, 4  ;;  %s325_s10 = int_to_ptr.vmem [resolvable:$true] %s324_s10 }
   0xf   :  { %448 = vmatprep.subr.bf16.mxu1 %v500_v3  ;;  %209 = vrot.lane.b32.xlu0 %v207_v39, %s503_s23  ;;  %v332_v40 = vld [vmem:[%s662_s5] ss:$0 sm:$0xff]  ;;  %v334_v45 = vld [vmem:[%s662_s5 + $0x1] ss:$0 sm:$0xff]  ;;  %v335_v58 = vld [vmem:[%s662_s5 + $0x2] ss:$0 sm:$0xff]  ;;  %p481_p1 = scmp.lt.s32.totalorder %s325_s10, %s325_s10 }
  0x10   :  { %438 = vmatpush3.bf16.msra.mxu0 %v437_v22  ;;  %v218_v49 = vld [vmem:[%s661_s4] sm:$0xff]  ;;  %s476_s5 = scalar_lea.vmem %s325_s10, 128 }
  0x11   :  { %463 = vmatprep.subr.bf16.mxu0 %v500_v3  ;;  %v464_v51 = vpack.c.bf16 %v219_v50, %v218_v49  ;;  %p477_p0 = scmp.ne.s32.totalorder %s325_s10, %s476_s5  ;;  %p482_p2 = scmp.lt.s32.totalorder %s476_s5, %s476_s5 }
  0x12   :  { %450 = vmatpush3.bf16.msra.mxu1 %v449_v25 }
  0x13   :  { %383 = vmatmul.mubr.msk.f32.vlgmr.msra.gmra.mrb[0].mxu0 %vm40_vm1, %v27_v26  ;;  %451 = vmatprep.subr.bf16.mxu1 %v500_v3  ;;  %p483_p3 = por %p482_p2, %p481_p1 }
  0x14   :  { %424 = vmatprep.mubr.msk.f32.mxu0 %vm501_vm0, %v502_v6  ;;  %465 = vmatpush3.bf16.msra.mxu0 %v464_v51 }
  0x15   :  { %p484_p4 = pnand %p483_p3, %p477_p0 }
  0x16   :  { %453 = vmatpush3.bf16.msra.mxu1 %v452_v29 }
  0x17   :  { %454 = vmatprep.subr.bf16.mxu1 %v500_v3 }
  0x1a   :  { %456 = vmatpush3.bf16.msra.mxu1 %v455_v32 }
  0x1b   :  { %457 = vmatprep.subr.bf16.mxu1 %v500_v3 }
  0x1e   :  { %459 = vmatpush3.bf16.msra.mxu1 %v458_v35 }
  0x1f   :  { %460 = vmatprep.subr.bf16.mxu1 %v500_v3 }
  0x22   :  { %462 = vmatpush3.bf16.msra.mxu1 %v461_v38 }
  0x81   :  { %v210_v53 = vpop.permute.xlu0 %209 }
  0xe6   :  { %v110_v41 = vpop.f32.mrb[0].mxu0 }
  0xe7   :  { %v111_v42 = vadd.f32 %v332_v40, %v110_v41  ;;  %v384_v43 = vpop.f32.mrb[1].mxu0 }
  0xe9   :  { %v114_v44 = vmax.f32 %v111_v42, 0.0 }
  0xeb   :  { %418 = vmatmul.mubr.f32.vlgmr.msra.gmra.mrb[0].mxu1 %v114_v44 }
 0x1be   :  { %v201_v46 = vpop.f32.mrb[0].mxu1 }
 0x1bf   :  { %v202_v47 = vadd.f32 %v334_v45, %v201_v46  ;;  %v419_v48 = vpop.f32.mrb[1].mxu1 }
 0x1c1   :  { %v205_v52 = vmul.f32 1.442695, %v202_v47  ;;  %300 = vrot.lane.b32.xlu1 %v202_v47, %s504_s2 }
 0x1c3   :  { %474 = vpow2.f32 %v205_v52 }
 0x1cd   :  { %v475_v54 = vpop.eup %474 }
 0x1ce   :  { %v212_v55 = vmul.f32 %v475_v54, %v210_v53  ;;  %306 = vrot.lane.b32.xlu1 %v475_v54, %s504_s2 }
 0x1d0   :  { %214 = vrot.lane.b32.xlu0 %v212_v55, %s505_s30 }
 0x233   :  { %v301_v59 = vpop.permute.xlu1 %300 }
 0x240   :  { %v307_v63 = vpop.permute.xlu1 %306 }
 0x242   :  { %v215_v56 = vpop.permute.xlu0 %214 }
 0x243   :  { %v217_v57 = vadd.f32 %v215_v56, %v202_v47 }
 0x245   :  { %311 = vrot.lane.b32.xlu0 %v217_v57, %s506_s7  ;;  %425 = vmatmul.mubr.msk.f32.vlgmr.msra.gmra.mrb[2].mxu0 %vm224_vm2, %v217_v57 }
 0x2b7   :  { %v312_v0 = vpop.permute.xlu0 %311 }
 0x318   :  { %v294_v60 = vpop.f32.mrb[2].mxu0 }
 0x319   :  { %v295_v61 = vadd.f32 %v335_v58, %v294_v60  ;;  %v426_v62 = vpop.f32.mrb[3].mxu0 }
 0x31b   :  { %298 = vst.msk [vmem:[#allocation2] sm:$0xff] %vm40_vm1, %v295_v61 }
 0x31c   :  { %304 = vst.msk [vmem:[#allocation2] sm:$0xff] %vm303_vm3, %v301_v59 }
 0x31d   :  { %310 = vst.msk [vmem:[#allocation2] sm:$0xff] %vm309_vm4, %v307_v63 }
 0x31e   :  { %315 = vst.msk [vmem:[#allocation2] sm:$0xff] %vm314_vm5, %v312_v0 }
 0x31f   :  { %317 = vst.msk [vmem:[#allocation2] sm:$0xff] %vm316_vm6, %v502_v6 }
 0x320   :  { %487 = shalt.err (!%p484_p4)
}
 0x321   :  { %s488_s12 = scalar_lea.hbm %s663_s6, 128 }
 0x322   :  { %p489_p5 = scmp.ne.s32.totalorder %s663_s6, %s488_s12  ;;  %p492_p6 = scmp.lt.u32.totalorder %s488_s12, %s663_s6 }
 0x324   :  { %p494_p7 = pnand %p492_p6, %p489_p5 }
 0x326   :  { %497 = shalt.err (!%p494_p7)
}
 0x327   :  { %327 = dma.vmem_to_hbm [thread:$0]  %s325_s10, 128, %s663_s6, [#allocation3]  }
 0x328   :  { %498 = dma.done.wait [#allocation3], 128  }
 0x329   :  { %499 = vsyncadd [#allocation3], 4294967168 }
 0x32a   :  { %331 = vsyncpa [#allocation3], 1 }

</bundles_post_ra>
